<compile_context>
chip_gen: v7x
topology: tpu7x:2x2x1
jax: 0.10.0
libtpu: 0.0.40
codegen_flags: <defaults>
</compile_context>

<pallas_src>
import jax
import jax.numpy as jnp
from jax.experimental import pallas as pl
from jax.experimental.pallas import tpu as pltpu


def _w2v_kernel(emb_ref, w_ref, o_ref):
    # emb_ref: (Bp, E)  f32  gathered central-word embeddings (grid-invariant)
    # w_ref:   (E, tn)  f32  lane-dense tile of the context weight (W.T)
    # o_ref:   (Bp, tn) f32  tile of the similarity logits
    o_ref[...] = jnp.dot(
        emb_ref[...], w_ref[...],
        preferred_element_type=jnp.float32,
    ).astype(o_ref.dtype)


def _choose_vocab_tile(N, max_tile=2048):
    """Largest lane-aligned (mult of 128) divisor of N up to max_tile; else full N."""
    if N <= max_tile:
        return N
    t = (max_tile // 128) * 128
    while t >= 128:
        if N % t == 0:
            return t
        t -= 128
    # No lane-aligned divisor: fall back to a single full-extent block
    # (block == full array dim is always legal).
    return N


def word2vec_forward(x_idx, emb_table, lin_weight, *, max_vocab_tile=2048):
    """x_idx: (B,) int; emb_table: (N, E) f32; lin_weight: (N, E) f32 -> (B, N) f32."""
    B = x_idx.shape[0]
    N, E = emb_table.shape
    assert lin_weight.shape == (N, E)

    tn = _choose_vocab_tile(N, max_vocab_tile)

    # Grid-invariant embedding gather, done once outside the grid loop.
    emb = jnp.take(emb_table, x_idx.astype(jnp.int32), axis=0)      # (B, E)

    # Pad batch to a sublane multiple so output stores are unmasked.
    Bp = ((B + 7) // 8) * 8
    if Bp != B:
        emb = jnp.pad(emb, ((0, Bp - B), (0, 0)))

    # Store the context weight as (E, N): N on the lane axis -> dense weight
    # tile DMAs and no per-step transpose inside the kernel.
    w_t = lin_weight.T                                              # (E, N)

    cost = pl.CostEstimate(
        flops=2 * Bp * N * E,
        transcendentals=0,
        bytes_accessed=N * E * 4 + Bp * E * 4 + Bp * N * 4,
    )

    out = pl.pallas_call(
        _w2v_kernel,
        out_shape=jax.ShapeDtypeStruct((Bp, N), jnp.float32),
        grid_spec=pltpu.PrefetchScalarGridSpec(
            num_scalar_prefetch=0,
            grid=(N // tn,),
            in_specs=[
                pl.BlockSpec((Bp, E), lambda n: (0, 0)),   # gathered embeddings (full)
                pl.BlockSpec((E, tn), lambda n: (0, n)),   # lane-dense weight tile
            ],
            out_specs=pl.BlockSpec((Bp, tn), lambda n: (0, n)),
        ),
        compiler_params=pltpu.CompilerParams(
            dimension_semantics=("parallel",)),
        cost_estimate=cost,
    )(emb, w_t)

    if Bp != B:
        out = out[:B]
    return out


if __name__ == "__main__":
    # Small, deterministic setup consistent with the module's __init__.
    n_words = 256
    embedding_dim = 32
    batch = 8

    key = jax.random.PRNGKey(0)
    k_emb, k_lin, k_x = jax.random.split(key, 3)

    # torch.nn.Embedding default init: N(0, 1)
    emb_table = jax.random.normal(k_emb, (n_words, embedding_dim), jnp.float32)
    # torch.nn.Linear default init: U(-1/sqrt(fan_in), 1/sqrt(fan_in))
    bound = 1.0 / (embedding_dim ** 0.5)
    lin_weight = jax.random.uniform(
        k_lin, (n_words, embedding_dim), jnp.float32, minval=-bound, maxval=bound)

    x_idx = jax.random.randint(k_x, (batch,), 0, n_words, dtype=jnp.int32)

    out = word2vec_forward(x_idx, emb_table, lin_weight)
    out = jax.block_until_ready(out)

    # Reference (pure JAX) check of the forward semantics.
    ref = emb_table[x_idx] @ lin_weight.T
    assert out.shape == (batch, n_words)
    assert out.dtype == jnp.float32
    assert jnp.allclose(out, ref, atol=1e-4, rtol=1e-4)

    print("KERNEL_OK")
</pallas_src>

<mosaic_0001>
module attributes {stable_mosaic.version = 11 : i64} {
  func.func @_w2v_kernel(%arg0: i32, %arg1: memref<8x32xf32, #tpu.memory_space<vmem>>, %arg2: memref<32x256xf32, #tpu.memory_space<vmem>>, %arg3: memref<8x256xf32, #tpu.memory_space<vmem>>) attributes {dimension_semantics = [#tpu.dimension_semantics<parallel>], iteration_bounds = array<i64: 1>, scalar_prefetch = 0 : i64, scratch_operands = 0 : i64, tpu.core_type = #tpu.core_type<tc>, window_params = [{pipeline_mode = #tpu.pipeline_mode<synchronous>, transform_indices = @transform_0, window_bounds = array<i64: 8, 32>}, {transform_indices = @transform_1, window_bounds = array<i64: 32, 256>}, {transform_indices = @transform_2, window_bounds = array<i64: 8, 256>}]} {
    %c0 = arith.constant 0 : index
    %c0_0 = arith.constant 0 : index
    %0 = vector.load %arg1[%c0, %c0_0] : memref<8x32xf32, #tpu.memory_space<vmem>>, vector<8x32xf32>
    %c0_1 = arith.constant 0 : index
    %c0_2 = arith.constant 0 : index
    %1 = vector.load %arg2[%c0_1, %c0_2] : memref<32x256xf32, #tpu.memory_space<vmem>>, vector<32x256xf32>
    %cst = arith.constant dense<0.000000e+00> : vector<8x256xf32>
    %2 = tpu.matmul %0, %1, %cst {dimension_numbers = #tpu.dot_dimension_numbers<[1], [0], [0], [1], [0, 0, 1, 1], [], []>} : vector<8x32xf32>, vector<32x256xf32>, vector<8x256xf32> -> vector<8x256xf32>
    %c0_3 = arith.constant 0 : index
    %c0_4 = arith.constant 0 : index
    %3 = vector.load %arg3[%c0_3, %c0_4] : memref<8x256xf32, #tpu.memory_space<vmem>>, vector<8x256xf32>
    tpu.vector_store %arg3[%c0_3, %c0_4], %2 {strides = array<i32>} : memref<8x256xf32, #tpu.memory_space<vmem>>, vector<8x256xf32>,
    return
  }
  func.func @transform_0(%arg0: i32) -> (i32, i32) {
    %c0_i32 = arith.constant 0 : i32
    %c0_i32_0 = arith.constant 0 : i32
    %c0_i32_1 = arith.constant 0 : i32
    return %c0_i32, %c0_i32_0 : i32, i32
  }
  func.func @transform_1(%arg0: i32) -> (i32, i32) {
    %c0_i32 = arith.constant 0 : i32
    %c0_i32_0 = arith.constant 0 : i32
    return %c0_i32, %arg0 : i32, i32
  }
  func.func @transform_2(%arg0: i32) -> (i32, i32) {
    %c0_i32 = arith.constant 0 : i32
    %c0_i32_0 = arith.constant 0 : i32
    return %c0_i32, %arg0 : i32, i32
  }
}

</mosaic_0001>

<bundles_post_ra>
// kernel: tpu_custom_call.1
= control target key start
LH: loop header
LB: loop body
LE: loop exit
PB: predicated region body
PF: predicated region fallthrough
CT: control target
= control target key end

     0   :  { %7 = vsyncpa [#allocation3], 0  ;;  %s291_s0 = inlined_call_operand.hbm [shape: f32[8,32], index: 0, kind: input, shape index: {}]   ;;  %s292_s1 = inlined_call_operand.hbm [shape: f32[32,256], index: 1, kind: input, shape index: {}]   ;;  %s293_s2 = inlined_call_operand.hbm [shape: f32[8,256], index: 2, kind: output, shape index: {}]  }
   0x1   :  { %8 = vsyncpa [#allocation6], 0 }
   0x2   :  { %9 = vsyncpa [#allocation4], 0  ;;  %s227_s9 = smov [#allocation2]   ;;  %s228_s11 = smov [#allocation5]  }
   0x3   :  { %s16_s10 = sshll.u32 %s227_s9, 4  ;;  %s25_s12 = sshll.u32 %s228_s11, 4  ;;  %s17_s10 = int_to_ptr.vmem [resolvable:$true] %s16_s10  ;;  %s248_s12 = int_to_ptr.vmem [resolvable:$true] %s25_s12 }
   0x4   :  { %s155_s15 = scalar_lea.hbm %s291_s0, 128 }
   0x5   :  { %p156_p0 = scmp.ne.s32.totalorder %s291_s0, %s155_s15  ;;  %p159_p1 = scmp.lt.u32.totalorder %s155_s15, %s291_s0 }
   0x7   :  { %p161_p2 = pnand %p159_p1, %p156_p0 }
   0x9   :  { %164 = shalt.err (!%p161_p2)
}
   0xa   :  { %s165_s20 = scalar_lea.vmem %s17_s10, 128  ;;  %p170_p4 = scmp.lt.s32.totalorder %s17_s10, %s17_s10 }
   0xb   :  { %p166_p3 = scmp.ne.s32.totalorder %s17_s10, %s165_s20  ;;  %p171_p5 = scmp.lt.s32.totalorder %s165_s20, %s165_s20 }
   0xd   :  { %p172_p6 = por %p171_p5, %p170_p4 }
   0xf   :  { %p173_p7 = pnand %p172_p6, %p166_p3 }
  0x11   :  { %176 = shalt.err (!%p173_p7)
}
  0x12   :  { %19 = dma.hbm_to_vmem [thread:$0]  %s291_s0, 128, %s17_s10, [#allocation3]  }
  0x13   :  { %s177_s25 = scalar_lea.hbm %s292_s1, 1024 }
  0x14   :  { %p178_p8 = scmp.ne.s32.totalorder %s292_s1, %s177_s25  ;;  %p181_p9 = scmp.lt.u32.totalorder %s177_s25, %s292_s1 }
  0x16   :  { %p183_p10 = pnand %p181_p9, %p178_p8 }
  0x18   :  { %186 = shalt.err (!%p183_p10)
}
  0x19   :  { %s187_s30 = scalar_lea.vmem %s248_s12, 1024  ;;  %p192_p12 = scmp.lt.s32.totalorder %s248_s12, %s248_s12 }
  0x1a   :  { %p188_p11 = scmp.ne.s32.totalorder %s248_s12, %s187_s30  ;;  %p193_p13 = scmp.lt.s32.totalorder %s187_s30, %s187_s30 }
  0x1c   :  { %p194_p0 = por %p193_p13, %p192_p12 }
  0x1e   :  { %p195_p1 = pnand %p194_p0, %p188_p11 }
  0x20   :  { %198 = shalt.err (!%p195_p1)
}
  0x21   :  { %s229_s0 = smov 256   ;;  %s230_s3 = smov 16  }
  0x22   :  { %31 = dma.hbm_to_vmem [thread:$0]  %s292_s1, 1024, %s248_s12, [#allocation6], %s229_s0, %s229_s0, %s230_s3  }
  0x23   :  { %221 = dma.done.wait [#allocation3], 128  }
  0x24   :  { %222 = vsyncadd [#allocation3], 4294967168 }
  0x25   :  { %223 = dma.done.wait [#allocation6], 1024  }
  0x26   :  { %224 = vsyncadd [#allocation6], 4294966272  ;;  %v231_v0 = vmov 0.0   ;;  %v40_v1 = vld [vmem:[#allocation5 + $0x8] sm:$0xff]  ;;  %v42_v2 = vld [vmem:[#allocation5 + $0x18] sm:$0xff]  ;;  %vm47_vm0 = vcmask 261120  }
  0x27   :  { %115 = vmatprep.mubr.f32.mxu0 %v231_v0  ;;  %v39_v3 = vld [vmem:[#allocation5] sm:$0xff]  ;;  %v141_v4 = vpack.c.bf16 %v42_v2, %v40_v1  ;;  %v41_v5 = vld [vmem:[#allocation5 + $0x10] sm:$0xff]  ;;  %v44_v6 = vld [vmem:[#allocation5 + $0x28] sm:$0xff]  ;;  %s232_s1 = smov [#allocation7]  }
  0x28   :  { %v46_v7 = vld [vmem:[#allocation5 + $0x38] sm:$0xff]  ;;  %v143_v8 = vpack.c.bf16 %v41_v5, %v39_v3  ;;  %v43_v10 = vld [vmem:[#allocation5 + $0x20] sm:$0xff]  ;;  %v45_v11 = vld [vmem:[#allocation5 + $0x30] sm:$0xff]  ;;  %s130_s6 = sshll.u32 %s232_s1, 4  ;;  %s131_s6 = int_to_ptr.vmem [resolvable:$true] %s130_s6 }
  0x29   :  { %v145_v9 = vpack.c.bf16 %v46_v7, %v44_v6  ;;  %142 = vmatprep.subr.bf16.mxu0 %v141_v4  ;;  %v147_v12 = vpack.c.bf16 %v45_v11, %v43_v10  ;;  %v38_v13 = vld [vmem:[#allocation2] sm:$0xff]  ;;  %s199_s7 = scalar_lea.vmem %s131_s6, 256  ;;  %p204_p3 = scmp.lt.s32.totalorder %s131_s6, %s131_s6 }
  0x2a   :  { %144 = vmatpush1.bf16.msra.mxu0 %v143_v8  ;;  %p200_p2 = scmp.ne.s32.totalorder %s131_s6, %s199_s7  ;;  %p205_p4 = scmp.lt.s32.totalorder %s199_s7, %s199_s7 }
  0x2b   :  { %146 = vmatprep.subr.bf16.mxu0 %v145_v9 }
  0x2c   :  { %p206_p5 = por %p205_p4, %p204_p3 }
  0x2e   :  { %148 = vmatpush1.bf16.msra.mxu0 %v147_v12  ;;  %p207_p6 = pnand %p206_p5, %p200_p2 }
  0x31   :  { %140 = vmatmul.mubr.msk.f32.vlgmr.msra.gmra.mrb[0].mxu0 %vm47_vm0, %v38_v13 }
 0x104   :  { %v117_v14 = vpop.f32.mrb[0].mxu0 }
 0x105   :  { %122 = vst [vmem:[#allocation7] sm:$0xff] %v117_v14  ;;  %v119_v15 = vpop.f32.mrb[1].mxu0 }
 0x106   :  { %123 = vst [vmem:[#allocation7 + $0x8] sm:$0xff] %v119_v15 }
 0x107   :  { %210 = shalt.err (!%p207_p6)
}
 0x108   :  { %s211_s10 = scalar_lea.hbm %s293_s2, 256 }
 0x109   :  { %p212_p7 = scmp.ne.s32.totalorder %s293_s2, %s211_s10  ;;  %p215_p8 = scmp.lt.u32.totalorder %s211_s10, %s293_s2 }
 0x10b   :  { %p217_p9 = pnand %p215_p8, %p212_p7 }
 0x10d   :  { %220 = shalt.err (!%p217_p9)
}
 0x10e   :  { %133 = dma.vmem_to_hbm [thread:$0]  %s131_s6, 256, %s293_s2, [#allocation4]  }
 0x10f   :  { %225 = dma.done.wait [#allocation4], 256  }
 0x110   :  { %226 = vsyncadd [#allocation4], 4294967040 }
 0x111   :  { %137 = vsyncpa [#allocation3], 1 }
 0x112   :  { %138 = vsyncpa [#allocation6], 1 }
 0x113   :  { %139 = vsyncpa [#allocation4], 1 }

</bundles_post_ra>
